<compile_context>
chip_gen: v6e
topology: v6e:2x2x1
jax: 0.10.0
libtpu: 0.0.40
codegen_flags: <defaults>
</compile_context>

<pallas_src>
import jax
import jax.numpy as jnp
from jax.experimental import pallas as pl
from jax.experimental.pallas import tpu as pltpu


def _round_up(n, m):
    return ((n + m - 1) // m) * m


def _pick_tb(B, block_b):
    """Largest batch tile (multiple of 8) <= block_b; split one huge step in two
    so a v7x megacore can shard the batch axis across both TensorCores."""
    tb = min(_round_up(block_b, 8), _round_up(B, 8))
    if B > 4096 and B <= tb:
        tb = _round_up((B + 1) // 2, 8)
    return max(tb, 8)


def _antecedent_kernel(w1_ref, w2_ref, c2w_ref, x_ref, *out_refs):
    """Per-batch-tile body: two small MXU matmuls + in-kernel softmax.

    temp = (x*x) @ w1 + x @ w2 + c2w   with
      w1 = -1/(2(s^2+eps)(a^2+eps)) / D,  w2 = -2*c*w1*D/D,  c2w = sum_d c^2*w1
    which equals  sum_d -(x_d-c_dr)^2 / (2(s^2+eps)(a^2+eps)) / D.
    """
    frs_ref = out_refs[0]
    temp_ref = out_refs[1] if len(out_refs) > 1 else None

    x = x_ref[...].astype(jnp.float32)                               # (TB, D)
    temp = (jnp.dot(x * x, w1_ref[...], preferred_element_type=jnp.float32)
            + jnp.dot(x, w2_ref[...], preferred_element_type=jnp.float32)
            + c2w_ref[...])                                          # (TB, R)

    # softmax over the rule axis (R kept whole per block — never tiled)
    m = jnp.max(temp, axis=-1, keepdims=True)
    e = jnp.exp(temp - m)
    denom = jnp.sum(e, axis=-1, keepdims=True)
    frs_ref[...] = (e / denom).astype(frs_ref.dtype)                 # exact normalization

    if temp_ref is not None:
        temp_ref[...] = temp.astype(temp_ref.dtype)


def antecedent_sonfin_forward(x, center, sigma, alpha, *, eps=1e-16,
                              block_b=4096, original_frs=False):
    """Pallas implementation of AntecedentSONFIN.forward(X) with using_alpha=True.

    Returns frs (default) or (frs, temp) if original_frs=True, matching the module.
    """
    if x.ndim == 0:
        x = x[None, None]
    elif x.ndim == 1:
        x = x[None, :]
    B, D = x.shape
    Dc, R = center.shape
    assert Dc == D and sigma.shape == (D, R) and alpha.shape == (D, R)

    # ---- tiny parameter prep in plain jnp (O(D*R); XLA fuses it) ----------------
    c = center.astype(jnp.float32)
    s = sigma.astype(jnp.float32)
    a = alpha.astype(jnp.float32)
    inv_d = jnp.float32(1.0 / D)
    w = (-0.5 / (s * s + eps)) * (1.0 / (a * a + eps))               # (D, R) neg precision
    w1 = w * inv_d                                                   # (D, R)
    w2 = (-2.0 * inv_d) * (c * w)                                    # (D, R)
    c2w = jnp.sum(c * c * w, axis=0, keepdims=True) * inv_d          # (1, R)

    # ---- batch-tiled main kernel -------------------------------------------------
    TB = _pick_tb(B, block_b)
    Bp = _round_up(B, TB)
    xp = x if Bp == B else jnp.pad(x, ((0, Bp - B), (0, 0)))

    n_out = 2 if original_frs else 1
    out_shape = tuple(jax.ShapeDtypeStruct((Bp, R), jnp.float32) for _ in range(n_out))
    out_specs = tuple(pl.BlockSpec((TB, R), lambda i: (i, 0)) for _ in range(n_out))

    outs = pl.pallas_call(
        _antecedent_kernel,
        out_shape=out_shape,
        grid=(Bp // TB,),
        in_specs=[pl.BlockSpec((D, R), lambda i: (0, 0)),            # resident w1
                  pl.BlockSpec((D, R), lambda i: (0, 0)),            # resident w2
                  pl.BlockSpec((1, R), lambda i: (0, 0)),            # resident bias
                  pl.BlockSpec((TB, D), lambda i: (i, 0))],          # streamed x tile
        out_specs=out_specs,
        compiler_params=pltpu.CompilerParams(
            dimension_semantics=("parallel",)),                      # v7x: shard batch over 2 TCs
    )(w1, w2, c2w, xp)

    outs = [o if Bp == B else o[:B] for o in outs]
    if original_frs:
        return outs[0], outs[1]
    return outs[0]


if __name__ == "__main__":
    B, in_dim, n_rule = 256, 32, 16
    eps = 1e-16

    key = jax.random.PRNGKey(0)
    kx, kc = jax.random.split(key)

    # deterministic parameter init mirroring __build_model__/reset_parameters:
    #   center ~ N(0, 1), sigma = init_sigma default = ones, alpha = 1.0
    x = jax.random.normal(kx, (B, in_dim), dtype=jnp.float32)
    center = jax.random.normal(kc, (in_dim, n_rule), dtype=jnp.float32)
    sigma = jnp.ones((in_dim, n_rule), dtype=jnp.float32)
    alpha = jnp.ones((in_dim, n_rule), dtype=jnp.float32)

    # pure-JAX reference of the PyTorch using_alpha branch (direct formula)
    expo = (-(x[:, :, None] - center[None, :, :]) ** 2
            / (2.0 * (sigma[None, :, :] ** 2 + eps))
            * (1.0 / (alpha[None, :, :] ** 2 + eps)))
    temp_ref = expo.sum(axis=1) / in_dim
    frs_ref = jax.nn.softmax(temp_ref, axis=1)

    # 1) module-default path: frs only, single tile (TB = B)
    frs_only = antecedent_sonfin_forward(x, center, sigma, alpha, eps=eps)
    frs_only = jax.block_until_ready(frs_only)
    assert frs_only.shape == (B, n_rule)
    assert jnp.allclose(frs_only, frs_ref, atol=1e-4, rtol=1e-4), \
        float(jnp.max(jnp.abs(frs_only - frs_ref)))

    # 2) original_frs path with block_b=64 -> 4 batch tiles: exercises the
    #    pipelined, "parallel" grid at small shapes.
    frs, temp = antecedent_sonfin_forward(x, center, sigma, alpha, eps=eps,
                                          block_b=64, original_frs=True)
    frs = jax.block_until_ready(frs)
    temp = jax.block_until_ready(temp)
    assert frs.shape == (B, n_rule) and temp.shape == (B, n_rule)
    assert jnp.allclose(temp, temp_ref, atol=1e-4, rtol=1e-4), \
        float(jnp.max(jnp.abs(temp - temp_ref)))
    assert jnp.allclose(frs, frs_ref, atol=1e-4, rtol=1e-4), \
        float(jnp.max(jnp.abs(frs - frs_ref)))

    print("KERNEL_OK")
</pallas_src>

<mosaic_0001>
module attributes {stable_mosaic.version = 11 : i64} {
  func.func @_antecedent_kernel(%arg0: i32, %arg1: memref<32x16xf32, #tpu.memory_space<vmem>>, %arg2: memref<32x16xf32, #tpu.memory_space<vmem>>, %arg3: memref<1x16xf32, #tpu.memory_space<vmem>>, %arg4: memref<256x32xf32, #tpu.memory_space<vmem>>, %arg5: memref<256x16xf32, #tpu.memory_space<vmem>>) attributes {dimension_semantics = [#tpu.dimension_semantics<parallel>], iteration_bounds = array<i64: 1>, scalar_prefetch = 0 : i64, scratch_operands = 0 : i64, tpu.core_type = #tpu.core_type<tc>, window_params = [{pipeline_mode = #tpu.pipeline_mode<synchronous>, transform_indices = @transform_0, window_bounds = array<i64: 32, 16>}, {pipeline_mode = #tpu.pipeline_mode<synchronous>, transform_indices = @transform_1, window_bounds = array<i64: 32, 16>}, {pipeline_mode = #tpu.pipeline_mode<synchronous>, transform_indices = @transform_2, window_bounds = array<i64: 1, 16>}, {transform_indices = @transform_3, window_bounds = array<i64: 256, 32>}, {transform_indices = @transform_4, window_bounds = array<i64: 256, 16>}]} {
    %c0 = arith.constant 0 : index
    %c0_0 = arith.constant 0 : index
    %0 = vector.load %arg4[%c0, %c0_0] : memref<256x32xf32, #tpu.memory_space<vmem>>, vector<256x32xf32>
    %1 = arith.mulf %0, %0 : vector<256x32xf32>
    %c0_1 = arith.constant 0 : index
    %c0_2 = arith.constant 0 : index
    %2 = vector.load %arg1[%c0_1, %c0_2] : memref<32x16xf32, #tpu.memory_space<vmem>>, vector<32x16xf32>
    %cst = arith.constant dense<0.000000e+00> : vector<256x16xf32>
    %3 = tpu.matmul %1, %2, %cst {dimension_numbers = #tpu.dot_dimension_numbers<[1], [0], [0], [1], [0, 0, 1, 1], [], []>} : vector<256x32xf32>, vector<32x16xf32>, vector<256x16xf32> -> vector<256x16xf32>
    %c0_3 = arith.constant 0 : index
    %c0_4 = arith.constant 0 : index
    %4 = vector.load %arg2[%c0_3, %c0_4] : memref<32x16xf32, #tpu.memory_space<vmem>>, vector<32x16xf32>
    %cst_5 = arith.constant dense<0.000000e+00> : vector<256x16xf32>
    %5 = tpu.matmul %0, %4, %cst_5 {dimension_numbers = #tpu.dot_dimension_numbers<[1], [0], [0], [1], [0, 0, 1, 1], [], []>} : vector<256x32xf32>, vector<32x16xf32>, vector<256x16xf32> -> vector<256x16xf32>
    %6 = arith.addf %3, %5 : vector<256x16xf32>
    %c0_6 = arith.constant 0 : index
    %c0_7 = arith.constant 0 : index
    %7 = vector.load %arg3[%c0_6, %c0_7] : memref<1x16xf32, #tpu.memory_space<vmem>>, vector<1x16xf32>
    %8 = vector.broadcast %7 : vector<1x16xf32> to vector<256x16xf32>
    %9 = arith.addf %6, %8 : vector<256x16xf32>
    %cst_8 = arith.constant dense<0xFF800000> : vector<256xf32>
    %10 = vector.multi_reduction <maximumf>, %9, %cst_8 [1] : vector<256x16xf32> to vector<256xf32>
    %11 = vector.shape_cast %10 : vector<256xf32> to vector<256x1xf32>
    %12 = vector.broadcast %11 : vector<256x1xf32> to vector<256x16xf32>
    %13 = arith.subf %9, %12 : vector<256x16xf32>
    %14 = math.exp %13 : vector<256x16xf32>
    %cst_9 = arith.constant dense<0.000000e+00> : vector<256xf32>
    %15 = vector.multi_reduction <add>, %14, %cst_9 [1] : vector<256x16xf32> to vector<256xf32>
    %16 = vector.shape_cast %15 : vector<256xf32> to vector<256x1xf32>
    %17 = vector.broadcast %16 : vector<256x1xf32> to vector<256x16xf32>
    %18 = arith.divf %14, %17 : vector<256x16xf32>
    %c0_10 = arith.constant 0 : index
    %c0_11 = arith.constant 0 : index
    %19 = vector.load %arg5[%c0_10, %c0_11] : memref<256x16xf32, #tpu.memory_space<vmem>>, vector<256x16xf32>
    tpu.vector_store %arg5[%c0_10, %c0_11], %18 {strides = array<i32>} : memref<256x16xf32, #tpu.memory_space<vmem>>, vector<256x16xf32>,
    return
  }
  func.func @transform_0(%arg0: i32) -> (i32, i32) {
    %c0_i32 = arith.constant 0 : i32
    %c0_i32_0 = arith.constant 0 : i32
    %c0_i32_1 = arith.constant 0 : i32
    return %c0_i32, %c0_i32_0 : i32, i32
  }
  func.func @transform_1(%arg0: i32) -> (i32, i32) {
    %c0_i32 = arith.constant 0 : i32
    %c0_i32_0 = arith.constant 0 : i32
    %c0_i32_1 = arith.constant 0 : i32
    return %c0_i32, %c0_i32_0 : i32, i32
  }
  func.func @transform_2(%arg0: i32) -> (i32, i32) {
    %c0_i32 = arith.constant 0 : i32
    %c0_i32_0 = arith.constant 0 : i32
    %c0_i32_1 = arith.constant 0 : i32
    return %c0_i32, %c0_i32_0 : i32, i32
  }
  func.func @transform_3(%arg0: i32) -> (i32, i32) {
    %c0_i32 = arith.constant 0 : i32
    %c0_i32_0 = arith.constant 0 : i32
    return %arg0, %c0_i32 : i32, i32
  }
  func.func @transform_4(%arg0: i32) -> (i32, i32) {
    %c0_i32 = arith.constant 0 : i32
    %c0_i32_0 = arith.constant 0 : i32
    return %arg0, %c0_i32 : i32, i32
  }
}

</mosaic_0001>

<bundles_post_ra>
// kernel: tpu_custom_call.1
= control target key start
LH: loop header
LB: loop body
LE: loop exit
PB: predicated region body
PF: predicated region fallthrough
CT: control target
= control target key end

     0   :  { %vm89_vm0 = vcmask 261120   ;;  %vm771_vm1 = vcmask 130048   ;;  %s2231_s1 = inlined_call_operand.vmem [shape: f32[32,16], index: 1, kind: input, shape index: {}]   ;;  %s2232_s0 = inlined_call_operand.vmem [shape: f32[32,16], index: 0, kind: input, shape index: {}]   ;;  %s2233_s3 = inlined_call_operand.vmem [shape: f32[256,32], index: 3, kind: input, shape index: {}]   ;;  %s2234_s2 = inlined_call_operand.vmem [shape: f32[1,16], index: 2, kind: input, shape index: {}]   ;;  %s2235_s4 = inlined_call_operand.vmem [shape: f32[256,16], index: 4, kind: output, shape index: {}]  }
   0x1   :  { %v88_v0 = vld [vmem:[%s2231_s1 + $0x18] sm:$0xff]  ;;  %v87_v2 = vld [vmem:[%s2231_s1 + $0x10] sm:$0xff]  ;;  %v86_v4 = vld [vmem:[%s2231_s1 + $0x8] sm:$0xff] }
   0x2   :  { %v84_v1 = vld [vmem:[%s2232_s0 + $0x18] sm:$0xff]  ;;  %1297 = vmatprep.subr.mxu0 %v88_v0  ;;  %v83_v3 = vld [vmem:[%s2232_s0 + $0x10] sm:$0xff]  ;;  %v82_v5 = vld [vmem:[%s2232_s0 + $0x8] sm:$0xff] }
   0x3   :  { %1353 = vmatprep.subr.mxu1 %v84_v1  ;;  %1298 = vmatpush3.msra.mxu0 %v88_v0  ;;  %v17_v6 = vld [vmem:[%s2233_s3] sm:$0xff]  ;;  %v18_v7 = vld [vmem:[%s2233_s3 + $0x8] sm:$0xff]  ;;  %v19_v10 = vld [vmem:[%s2233_s3 + $0x10] sm:$0xff] }
   0x4   :  { %1354 = vmatpush3.msra.mxu1 %v84_v1  ;;  %1299 = vmatprep.subr.mxu0 %v87_v2  ;;  %v85_v8 = vld [vmem:[%s2231_s1] sm:$0xff]  ;;  %v49_v11 = vmul.f32 %v17_v6, %v17_v6  ;;  %v50_v12 = vmul.f32 %v18_v7, %v18_v7  ;;  %v51_v13 = vmul.f32 %v19_v10, %v19_v10  ;;  %v20_v14 = vld [vmem:[%s2233_s3 + $0x18] sm:$0xff]  ;;  %v22_v18 = vld [vmem:[%s2233_s3 + $0x28] sm:$0xff] }
   0x5   :  { %1355 = vmatprep.subr.mxu1 %v83_v3  ;;  %1300 = vmatpush3.msra.mxu0 %v87_v2  ;;  %v81_v9 = vld [vmem:[%s2232_s0] sm:$0xff]  ;;  %v52_v16 = vmul.f32 %v20_v14, %v20_v14  ;;  %v23_v19 = vld [vmem:[%s2233_s3 + $0x30] sm:$0xff]  ;;  %v54_v20 = vmul.f32 %v22_v18, %v22_v18  ;;  %v24_v22 = vld [vmem:[%s2233_s3 + $0x38] sm:$0xff] }
   0x6   :  { %1356 = vmatpush3.msra.mxu1 %v83_v3  ;;  %1301 = vmatprep.subr.mxu0 %v86_v4  ;;  %v21_v15 = vld [vmem:[%s2233_s3 + $0x20] sm:$0xff]  ;;  %v55_v21 = vmul.f32 %v23_v19, %v23_v19  ;;  %v56_v24 = vmul.f32 %v24_v22, %v24_v22  ;;  %v26_v26 = vld [vmem:[%s2233_s3 + $0x48] sm:$0xff]  ;;  %v27_v27 = vld [vmem:[%s2233_s3 + $0x50] sm:$0xff] }
   0x7   :  { %1357 = vmatprep.subr.mxu1 %v82_v5  ;;  %1302 = vmatpush3.msra.mxu0 %v86_v4  ;;  %v53_v17 = vmul.f32 %v21_v15, %v21_v15  ;;  %v25_v23 = vld [vmem:[%s2233_s3 + $0x40] sm:$0xff]  ;;  %v58_v28 = vmul.f32 %v26_v26, %v26_v26  ;;  %v59_v29 = vmul.f32 %v27_v27, %v27_v27  ;;  %v28_v30 = vld [vmem:[%s2233_s3 + $0x58] sm:$0xff]  ;;  %v30_v34 = vld [vmem:[%s2233_s3 + $0x68] sm:$0xff] }
   0x8   :  { %1358 = vmatpush3.msra.mxu1 %v82_v5  ;;  %1303 = vmatprep.subr.mxu0 %v85_v8  ;;  %v57_v25 = vmul.f32 %v25_v23, %v25_v23  ;;  %v29_v31 = vld [vmem:[%s2233_s3 + $0x60] sm:$0xff]  ;;  %v60_v32 = vmul.f32 %v28_v30, %v28_v30  ;;  %v31_v35 = vld [vmem:[%s2233_s3 + $0x70] sm:$0xff]  ;;  %v62_v36 = vmul.f32 %v30_v34, %v30_v34  ;;  %v32_v38 = vld [vmem:[%s2233_s3 + $0x78] sm:$0xff] }
   0x9   :  { %1359 = vmatprep.subr.mxu1 %v81_v9  ;;  %1304 = vmatpush3.msra.mxu0 %v85_v8  ;;  %v61_v33 = vmul.f32 %v29_v31, %v29_v31  ;;  %v63_v37 = vmul.f32 %v31_v35, %v31_v35  ;;  %v33_v39 = vld [vmem:[%s2233_s3 + $0x80] sm:$0xff]  ;;  %v64_v40 = vmul.f32 %v32_v38, %v32_v38  ;;  %v34_v42 = vld [vmem:[%s2233_s3 + $0x88] sm:$0xff]  ;;  %v35_v43 = vld [vmem:[%s2233_s3 + $0x90] sm:$0xff] }
   0xa   :  { %1305 = vmatprep.mubr.msk.f32.mxu0 %vm89_vm0, %v17_v6  ;;  %1360 = vmatpush3.msra.mxu1 %v81_v9  ;;  %v65_v41 = vmul.f32 %v33_v39, %v33_v39  ;;  %v66_v44 = vmul.f32 %v34_v42, %v34_v42  ;;  %v67_v45 = vmul.f32 %v35_v43, %v35_v43  ;;  %v36_v46 = vld [vmem:[%s2233_s3 + $0x98] sm:$0xff]  ;;  %v37_v47 = vld [vmem:[%s2233_s3 + $0xa0] sm:$0xff]  ;;  %v38_v50 = vld [vmem:[%s2233_s3 + $0xa8] sm:$0xff] }
   0xb   :  { %1361 = vmatprep.mubr.msk.f32.mxu1 %vm89_vm0, %v49_v11  ;;  %1306 = vmatmul.mubr.msk.f32.vlgmr.msra.gmra.mxu0 %vm89_vm0, %v18_v7  ;;  %v68_v48 = vmul.f32 %v36_v46, %v36_v46  ;;  %v69_v49 = vmul.f32 %v37_v47, %v37_v47  ;;  %v39_v51 = vld [vmem:[%s2233_s3 + $0xb0] sm:$0xff]  ;;  %v70_v52 = vmul.f32 %v38_v50, %v38_v50  ;;  %v40_v54 = vld [vmem:[%s2233_s3 + $0xb8] sm:$0xff]  ;;  %v41_v55 = vld [vmem:[%s2233_s3 + $0xc0] sm:$0xff] }
   0xc   :  { %1362 = vmatmul.mubr.msk.f32.vlgmr.msra.gmra.mxu1 %vm89_vm0, %v50_v12  ;;  %1308 = vmatprep.mubr.msk.f32.mxu0 %vm89_vm0, %v19_v10  ;;  %v71_v53 = vmul.f32 %v39_v51, %v39_v51  ;;  %v72_v56 = vmul.f32 %v40_v54, %v40_v54  ;;  %v73_v57 = vmul.f32 %v41_v55, %v41_v55  ;;  %v42_v58 = vld [vmem:[%s2233_s3 + $0xc8] sm:$0xff]  ;;  %v43_v59 = vld [vmem:[%s2233_s3 + $0xd0] sm:$0xff]  ;;  %v44_v62 = vld [vmem:[%s2233_s3 + $0xd8] sm:$0xff] }
   0xd   :  { %1364 = vmatprep.mubr.msk.f32.mxu1 %vm89_vm0, %v51_v13  ;;  %v74_v60 = vmul.f32 %v42_v58, %v42_v58  ;;  %v75_v61 = vmul.f32 %v43_v59, %v43_v59  ;;  %v45_v63 = vld [vmem:[%s2233_s3 + $0xe0] sm:$0xff]  ;;  %v76_v0 = vmul.f32 %v44_v62, %v44_v62  ;;  %v46_v2 = vld [vmem:[%s2233_s3 + $0xe8] sm:$0xff]  ;;  %v47_v3 = vld [vmem:[%s2233_s3 + $0xf0] sm:$0xff] }
   0xe   :  { %v77_v1 = vmul.f32 %v45_v63, %v45_v63  ;;  %v78_v4 = vmul.f32 %v46_v2, %v46_v2  ;;  %v79_v5 = vmul.f32 %v47_v3, %v47_v3  ;;  %v48_v6 = vld [vmem:[%s2233_s3 + $0xf8] sm:$0xff]  ;;  %v1749_v10 = vld [vmem:[%s2234_s2] ss:$0 sm:$0xff] }
   0xf   :  { %1309 = vmatmul.mubr.msk.f32.gmra.mxu0 %vm89_vm0, %v20_v14  ;;  %v80_v7 = vmul.f32 %v48_v6, %v48_v6 }
  0x10   :  { %1365 = vmatmul.mubr.msk.f32.gmra.mxu1 %vm89_vm0, %v52_v16  ;;  %1311 = vmatprep.mubr.msk.f32.mxu0 %vm89_vm0, %v21_v15 }
  0x11   :  { %1367 = vmatprep.mubr.msk.f32.mxu1 %vm89_vm0, %v53_v17 }
  0x13   :  { %1312 = vmatmul.mubr.msk.f32.gmra.mxu0 %vm89_vm0, %v22_v18 }
  0x14   :  { %1368 = vmatmul.mubr.msk.f32.gmra.mxu1 %vm89_vm0, %v54_v20  ;;  %1314 = vmatprep.mubr.msk.f32.mxu0 %vm89_vm0, %v23_v19 }
  0x15   :  { %1370 = vmatprep.mubr.msk.f32.mxu1 %vm89_vm0, %v55_v21 }
  0x17   :  { %1315 = vmatmul.mubr.msk.f32.gmra.mxu0 %vm89_vm0, %v24_v22 }
  0x18   :  { %1371 = vmatmul.mubr.msk.f32.gmra.mxu1 %vm89_vm0, %v56_v24  ;;  %1317 = vmatprep.mubr.msk.f32.mxu0 %vm89_vm0, %v25_v23 }
  0x19   :  { %1373 = vmatprep.mubr.msk.f32.mxu1 %vm89_vm0, %v57_v25 }
  0x1b   :  { %1318 = vmatmul.mubr.msk.f32.gmra.mxu0 %vm89_vm0, %v26_v26 }
  0x1c   :  { %1374 = vmatmul.mubr.msk.f32.gmra.mxu1 %vm89_vm0, %v58_v28  ;;  %1320 = vmatprep.mubr.msk.f32.mxu0 %vm89_vm0, %v27_v27 }
  0x1d   :  { %1376 = vmatprep.mubr.msk.f32.mxu1 %vm89_vm0, %v59_v29 }
  0x1f   :  { %1321 = vmatmul.mubr.msk.f32.gmra.mxu0 %vm89_vm0, %v28_v30 }
  0x20   :  { %1377 = vmatmul.mubr.msk.f32.gmra.mxu1 %vm89_vm0, %v60_v32  ;;  %1323 = vmatprep.mubr.msk.f32.mxu0 %vm89_vm0, %v29_v31 }
  0x21   :  { %1379 = vmatprep.mubr.msk.f32.mxu1 %vm89_vm0, %v61_v33 }
  0x23   :  { %1324 = vmatmul.mubr.msk.f32.gmra.mxu0 %vm89_vm0, %v30_v34 }
  0x24   :  { %1380 = vmatmul.mubr.msk.f32.gmra.mxu1 %vm89_vm0, %v62_v36  ;;  %1326 = vmatprep.mubr.msk.f32.mxu0 %vm89_vm0, %v31_v35 }
  0x25   :  { %1382 = vmatprep.mubr.msk.f32.mxu1 %vm89_vm0, %v63_v37 }
  0x27   :  { %1327 = vmatmul.mubr.msk.f32.gmra.mxu0 %vm89_vm0, %v32_v38 }
  0x28   :  { %1383 = vmatmul.mubr.msk.f32.gmra.mxu1 %vm89_vm0, %v64_v40  ;;  %1329 = vmatprep.mubr.msk.f32.mxu0 %vm89_vm0, %v33_v39 }
  0x29   :  { %1385 = vmatprep.mubr.msk.f32.mxu1 %vm89_vm0, %v65_v41 }
  0x2b   :  { %1330 = vmatmul.mubr.msk.f32.gmra.mxu0 %vm89_vm0, %v34_v42 }
  0x2c   :  { %1386 = vmatmul.mubr.msk.f32.gmra.mxu1 %vm89_vm0, %v66_v44  ;;  %1332 = vmatprep.mubr.msk.f32.mxu0 %vm89_vm0, %v35_v43 }
  0x2d   :  { %1388 = vmatprep.mubr.msk.f32.mxu1 %vm89_vm0, %v67_v45 }
  0x2f   :  { %1333 = vmatmul.mubr.msk.f32.gmra.mxu0 %vm89_vm0, %v36_v46 }
  0x30   :  { %1389 = vmatmul.mubr.msk.f32.gmra.mxu1 %vm89_vm0, %v68_v48  ;;  %1335 = vmatprep.mubr.msk.f32.mxu0 %vm89_vm0, %v37_v47 }
  0x31   :  { %1391 = vmatprep.mubr.msk.f32.mxu1 %vm89_vm0, %v69_v49 }
  0x33   :  { %1336 = vmatmul.mubr.msk.f32.gmra.mxu0 %vm89_vm0, %v38_v50 }
  0x34   :  { %1392 = vmatmul.mubr.msk.f32.gmra.mxu1 %vm89_vm0, %v70_v52  ;;  %1338 = vmatprep.mubr.msk.f32.mxu0 %vm89_vm0, %v39_v51 }
  0x35   :  { %1394 = vmatprep.mubr.msk.f32.mxu1 %vm89_vm0, %v71_v53 }
  0x37   :  { %1339 = vmatmul.mubr.msk.f32.gmra.mxu0 %vm89_vm0, %v40_v54 }
  0x38   :  { %1395 = vmatmul.mubr.msk.f32.gmra.mxu1 %vm89_vm0, %v72_v56  ;;  %1341 = vmatprep.mubr.msk.f32.mxu0 %vm89_vm0, %v41_v55 }
  0x39   :  { %1397 = vmatprep.mubr.msk.f32.mxu1 %vm89_vm0, %v73_v57 }
  0x3b   :  { %1342 = vmatmul.mubr.msk.f32.gmra.mxu0 %vm89_vm0, %v42_v58 }
  0x3c   :  { %1398 = vmatmul.mubr.msk.f32.gmra.mxu1 %vm89_vm0, %v74_v60  ;;  %1344 = vmatprep.mubr.msk.f32.mxu0 %vm89_vm0, %v43_v59 }
  0x3d   :  { %1400 = vmatprep.mubr.msk.f32.mxu1 %vm89_vm0, %v75_v61 }
  0x3f   :  { %1345 = vmatmul.mubr.msk.f32.gmra.mxu0 %vm89_vm0, %v44_v62 }
  0x40   :  { %1401 = vmatmul.mubr.msk.f32.gmra.mxu1 %vm89_vm0, %v76_v0  ;;  %1347 = vmatprep.mubr.msk.f32.mxu0 %vm89_vm0, %v45_v63 }
  0x41   :  { %1403 = vmatprep.mubr.msk.f32.mxu1 %vm89_vm0, %v77_v1 }
  0x43   :  { %1348 = vmatmul.mubr.msk.f32.gmra.mxu0 %vm89_vm0, %v46_v2 }
  0x44   :  { %1404 = vmatmul.mubr.msk.f32.gmra.mxu1 %vm89_vm0, %v78_v4  ;;  %1350 = vmatprep.mubr.msk.f32.mxu0 %vm89_vm0, %v47_v3 }
  0x45   :  { %1406 = vmatprep.mubr.msk.f32.mxu1 %vm89_vm0, %v79_v5 }
  0x47   :  { %1351 = vmatmul.mubr.msk.f32.gmra.mxu0 %vm89_vm0, %v48_v6 }
  0x48   :  { %1407 = vmatmul.mubr.msk.f32.gmra.mxu1 %vm89_vm0, %v80_v7 }
  0xcb   :  { %v1307_v8 = vpop.f32.mrf.mxu0 }
  0xcc   :  { %v1363_v9 = vpop.f32.mrf.mxu1 }
  0xcd   :  { %v579_v11 = vadd.f32 %v1363_v9, %v1307_v8  ;;  %v252_v12 = vpop.f32.mrf.mxu0 }
  0xce   :  { %v573_v13 = vpop.f32.mrf.mxu1 }
  0xcf   :  { %v574_v14 = vadd.f32 %v573_v13, %v252_v12  ;;  %v1752_v15 = vadd.f32 %v1749_v10, %v579_v11  ;;  %v1310_v16 = vpop.f32.mrf.mxu0 }
  0xd0   :  { %v1366_v17 = vpop.f32.mrf.mxu1 }
  0xd1   :  { %v589_v18 = vadd.f32 %v1366_v17, %v1310_v16  ;;  %v775_v19 = vsel %vm771_vm1, %v1752_v15, -inf  ;;  %v1757_v20 = vadd.f32 %v1749_v10, %v574_v14  ;;  %v262_v21 = vpop.f32.mrf.mxu0 }
  0xd2   :  { %776 = vmax.xlane.f32.xlu0 %v775_v19  ;;  %v583_v22 = vpop.f32.mrf.mxu1 }
  0xd3   :  { %v584_v23 = vadd.f32 %v583_v22, %v262_v21  ;;  %v1760_v24 = vadd.f32 %v1749_v10, %v589_v18  ;;  %v1313_v25 = vpop.f32.mrf.mxu0  ;;  %v772_v29 = vsel %vm771_vm1, %v1757_v20, -inf }
  0xd4   :  { %v1369_v26 = vpop.f32.mrf.mxu1 }
  0xd5   :  { %v599_v27 = vadd.f32 %v1369_v26, %v1313_v25  ;;  %v781_v28 = vsel %vm771_vm1, %v1760_v24, -inf  ;;  %v1767_v30 = vadd.f32 %v1749_v10, %v584_v23  ;;  %v272_v31 = vpop.f32.mrf.mxu0 }
  0xd6   :  { %782 = vmax.xlane.f32.xlu1 %v781_v28  ;;  %v593_v32 = vpop.f32.mrf.mxu1  ;;  %773 = vmax.xlane.f32.xlu0 %v772_v29 }
  0xd7   :  { %v594_v33 = vadd.f32 %v593_v32, %v272_v31  ;;  %v1316_v34 = vpop.f32.mrf.mxu0  ;;  %v778_v37 = vsel %vm771_vm1, %v1767_v30, -inf  ;;  %v1775_v39 = vadd.f32 %v1749_v10, %v599_v27 }
  0xd8   :  { %v1372_v35 = vpop.f32.mrf.mxu1 }
  0xd9   :  { %v609_v36 = vadd.f32 %v1372_v35, %v1316_v34  ;;  %v1772_v38 = vadd.f32 %v1749_v10, %v594_v33  ;;  %v282_v40 = vpop.f32.mrf.mxu0  ;;  %v787_v47 = vsel %vm771_vm1, %v1775_v39, -inf }
  0xda   :  { %v603_v41 = vpop.f32.mrf.mxu1  ;;  %779 = vmax.xlane.f32.xlu1 %v778_v37 }
  0xdb   :  { %v604_v42 = vadd.f32 %v603_v41, %v282_v40  ;;  %v784_v43 = vsel %vm771_vm1, %v1772_v38, -inf  ;;  %v1319_v44 = vpop.f32.mrf.mxu0  ;;  %v1785_v49 = vadd.f32 %v1749_v10, %v609_v36 }
  0xdc   :  { %v1375_v45 = vpop.f32.mrf.mxu1  ;;  %785 = vmax.xlane.f32.xlu0 %v784_v43 }
  0xdd   :  { %v619_v46 = vadd.f32 %v1375_v45, %v1319_v44  ;;  %v1782_v48 = vadd.f32 %v1749_v10, %v604_v42  ;;  %v292_v50 = vpop.f32.mrf.mxu0  ;;  %v793_v57 = vsel %vm771_vm1, %v1785_v49, -inf }
  0xde   :  { %v613_v51 = vpop.f32.mrf.mxu1  ;;  %788 = vmax.xlane.f32.xlu1 %v787_v47 }
  0xdf   :  { %v614_v52 = vadd.f32 %v613_v51, %v292_v50  ;;  %v790_v53 = vsel %vm771_vm1, %v1782_v48, -inf  ;;  %v1322_v54 = vpop.f32.mrf.mxu0  ;;  %v1795_v59 = vadd.f32 %v1749_v10, %v619_v46 }
  0xe0   :  { %v1378_v55 = vpop.f32.mrf.mxu1  ;;  %791 = vmax.xlane.f32.xlu0 %v790_v53 }
  0xe1   :  { %v629_v56 = vadd.f32 %v1378_v55, %v1322_v54  ;;  %v1792_v58 = vadd.f32 %v1749_v10, %v614_v52  ;;  %v302_v60 = vpop.f32.mrf.mxu0  ;;  %v799_v3 = vsel %vm771_vm1, %v1795_v59, -inf }
  0xe2   :  { %v623_v61 = vpop.f32.mrf.mxu1  ;;  %794 = vmax.xlane.f32.xlu1 %v793_v57 }
  0xe3   :  { %v624_v62 = vadd.f32 %v623_v61, %v302_v60  ;;  %v796_v63 = vsel %vm771_vm1, %v1792_v58, -inf  ;;  %v1325_v0 = vpop.f32.mrf.mxu0  ;;  %v1805_v5 = vadd.f32 %v1749_v10, %v629_v56 }
  0xe4   :  { %v1381_v1 = vpop.f32.mrf.mxu1  ;;  %797 = vmax.xlane.f32.xlu0 %v796_v63 }
  0xe5   :  { %v639_v2 = vadd.f32 %v1381_v1, %v1325_v0  ;;  %v1802_v4 = vadd.f32 %v1749_v10, %v624_v62  ;;  %v312_v6 = vpop.f32.mrf.mxu0  ;;  %v805_v14 = vsel %vm771_vm1, %v1805_v5, -inf }
  0xe6   :  { %v633_v7 = vpop.f32.mrf.mxu1  ;;  %800 = vmax.xlane.f32.xlu1 %v799_v3 }
  0xe7   :  { %v634_v8 = vadd.f32 %v633_v7, %v312_v6  ;;  %v802_v9 = vsel %vm771_vm1, %v1802_v4, -inf  ;;  %v1328_v11 = vpop.f32.mrf.mxu0  ;;  %v1815_v17 = vadd.f32 %v1749_v10, %v639_v2 }
  0xe8   :  { %v1384_v12 = vpop.f32.mrf.mxu1  ;;  %803 = vmax.xlane.f32.xlu0 %v802_v9 }
  0xe9   :  { %v649_v13 = vadd.f32 %v1384_v12, %v1328_v11  ;;  %v1812_v16 = vadd.f32 %v1749_v10, %v634_v8  ;;  %v322_v18 = vpop.f32.mrf.mxu0  ;;  %v811_v27 = vsel %vm771_vm1, %v1815_v17, -inf }
  0xea   :  { %v643_v19 = vpop.f32.mrf.mxu1  ;;  %806 = vmax.xlane.f32.xlu1 %v805_v14 }
  0xeb   :  { %v644_v21 = vadd.f32 %v643_v19, %v322_v18  ;;  %v808_v22 = vsel %vm771_vm1, %v1812_v16, -inf  ;;  %v1331_v23 = vpop.f32.mrf.mxu0  ;;  %v1825_v29 = vadd.f32 %v1749_v10, %v649_v13 }
  0xec   :  { %v1387_v25 = vpop.f32.mrf.mxu1  ;;  %809 = vmax.xlane.f32.xlu0 %v808_v22 }
  0xed   :  { %v659_v26 = vadd.f32 %v1387_v25, %v1331_v23  ;;  %v1822_v28 = vadd.f32 %v1749_v10, %v644_v21  ;;  %v332_v31 = vpop.f32.mrf.mxu0  ;;  %v817_v40 = vsel %vm771_vm1, %v1825_v29, -inf }
  0xee   :  { %v653_v32 = vpop.f32.mrf.mxu1  ;;  %812 = vmax.xlane.f32.xlu1 %v811_v27 }
  0xef   :  { %v654_v33 = vadd.f32 %v653_v32, %v332_v31  ;;  %v814_v34 = vsel %vm771_vm1, %v1822_v28, -inf  ;;  %v1334_v35 = vpop.f32.mrf.mxu0  ;;  %v1835_v42 = vadd.f32 %v1749_v10, %v659_v26 }
  0xf0   :  { %v1390_v36 = vpop.f32.mrf.mxu1  ;;  %815 = vmax.xlane.f32.xlu0 %v814_v34 }
  0xf1   :  { %v669_v37 = vadd.f32 %v1390_v36, %v1334_v35  ;;  %v1832_v41 = vadd.f32 %v1749_v10, %v654_v33  ;;  %v342_v43 = vpop.f32.mrf.mxu0  ;;  %v823_v52 = vsel %vm771_vm1, %v1835_v42, -inf }
  0xf2   :  { %v663_v44 = vpop.f32.mrf.mxu1  ;;  %818 = vmax.xlane.f32.xlu1 %v817_v40 }
  0xf3   :  { %v664_v45 = vadd.f32 %v663_v44, %v342_v43  ;;  %v820_v46 = vsel %vm771_vm1, %v1832_v41, -inf  ;;  %v1337_v47 = vpop.f32.mrf.mxu0  ;;  %v1845_v54 = vadd.f32 %v1749_v10, %v669_v37 }
  0xf4   :  { %v1393_v50 = vpop.f32.mrf.mxu1  ;;  %821 = vmax.xlane.f32.xlu0 %v820_v46 }
  0xf5   :  { %v679_v51 = vadd.f32 %v1393_v50, %v1337_v47  ;;  %v1842_v53 = vadd.f32 %v1749_v10, %v664_v45  ;;  %v352_v55 = vpop.f32.mrf.mxu0  ;;  %v829_v0 = vsel %vm771_vm1, %v1845_v54, -inf }
  0xf6   :  { %v673_v56 = vpop.f32.mrf.mxu1  ;;  %824 = vmax.xlane.f32.xlu1 %v823_v52 }
  0xf7   :  { %v674_v57 = vadd.f32 %v673_v56, %v352_v55  ;;  %v826_v60 = vsel %vm771_vm1, %v1842_v53, -inf  ;;  %v1340_v61 = vpop.f32.mrf.mxu0  ;;  %v1855_v2 = vadd.f32 %v1749_v10, %v679_v51 }
  0xf8   :  { %v1396_v62 = vpop.f32.mrf.mxu1  ;;  %827 = vmax.xlane.f32.xlu0 %v826_v60 }
  0xf9   :  { %v689_v63 = vadd.f32 %v1396_v62, %v1340_v61  ;;  %v1852_v1 = vadd.f32 %v1749_v10, %v674_v57  ;;  %v362_v3 = vpop.f32.mrf.mxu0  ;;  %v835_v13 = vsel %vm771_vm1, %v1855_v2, -inf }
  0xfa   :  { %v683_v6 = vpop.f32.mrf.mxu1  ;;  %830 = vmax.xlane.f32.xlu1 %v829_v0 }
  0xfb   :  { %v684_v7 = vadd.f32 %v683_v6, %v362_v3  ;;  %v832_v8 = vsel %vm771_vm1, %v1852_v1, -inf  ;;  %v1343_v9 = vpop.f32.mrf.mxu0  ;;  %v1865_v18 = vadd.f32 %v1749_v10, %v689_v63 }
  0xfc   :  { %v1399_v11 = vpop.f32.mrf.mxu1  ;;  %833 = vmax.xlane.f32.xlu0 %v832_v8 }
  0xfd   :  { %v699_v12 = vadd.f32 %v1399_v11, %v1343_v9  ;;  %v1862_v14 = vadd.f32 %v1749_v10, %v684_v7  ;;  %v372_v19 = vpop.f32.mrf.mxu0  ;;  %v841_v31 = vsel %vm771_vm1, %v1865_v18, -inf }
  0xfe   :  { %v693_v21 = vpop.f32.mrf.mxu1  ;;  %836 = vmax.xlane.f32.xlu1 %v835_v13 }
  0xff   :  { %v694_v22 = vadd.f32 %v693_v21, %v372_v19  ;;  %v838_v23 = vsel %vm771_vm1, %v1862_v14, -inf  ;;  %v1346_v25 = vpop.f32.mrf.mxu0  ;;  %v1875_v33 = vadd.f32 %v1749_v10, %v699_v12 }
 0x100   :  { %v1402_v26 = vpop.f32.mrf.mxu1  ;;  %839 = vmax.xlane.f32.xlu0 %v838_v23 }
 0x101   :  { %v709_v27 = vadd.f32 %v1402_v26, %v1346_v25  ;;  %v1872_v32 = vadd.f32 %v1749_v10, %v694_v22  ;;  %v382_v34 = vpop.f32.mrf.mxu0  ;;  %v847_v45 = vsel %vm771_vm1, %v1875_v33, -inf }
 0x102   :  { %v703_v35 = vpop.f32.mrf.mxu1  ;;  %842 = vmax.xlane.f32.xlu1 %v841_v31 }
 0x103   :  { %v704_v36 = vadd.f32 %v703_v35, %v382_v34  ;;  %v844_v37 = vsel %vm771_vm1, %v1872_v32, -inf  ;;  %v1349_v40 = vpop.f32.mrf.mxu0  ;;  %v1885_v47 = vadd.f32 %v1749_v10, %v709_v27 }
 0x104   :  { %v1405_v43 = vpop.f32.mrf.mxu1  ;;  %845 = vmax.xlane.f32.xlu0 %v844_v37 }
 0x105   :  { %v719_v44 = vadd.f32 %v1405_v43, %v1349_v40  ;;  %v1882_v46 = vadd.f32 %v1749_v10, %v704_v36  ;;  %v392_v50 = vpop.f32.mrf.mxu0  ;;  %v853_v61 = vsel %vm771_vm1, %v1885_v47, -inf }
 0x106   :  { %v713_v51 = vpop.f32.mrf.mxu1  ;;  %848 = vmax.xlane.f32.xlu1 %v847_v45 }
 0x107   :  { %v714_v52 = vadd.f32 %v713_v51, %v392_v50  ;;  %v850_v55 = vsel %vm771_vm1, %v1882_v46, -inf  ;;  %v1352_v56 = vpop.f32.mrf.mxu0  ;;  %v1895_v63 = vadd.f32 %v1749_v10, %v719_v44 }
 0x108   :  { %v1408_v57 = vpop.f32.mrf.mxu1  ;;  %851 = vmax.xlane.f32.xlu0 %v850_v55 }
 0x109   :  { %v729_v60 = vadd.f32 %v1408_v57, %v1352_v56  ;;  %v1892_v62 = vadd.f32 %v1749_v10, %v714_v52  ;;  %v402_v0 = vpop.f32.mrf.mxu0  ;;  %v859_v8 = vsel %vm771_vm1, %v1895_v63, -inf }
 0x10a   :  { %v723_v3 = vpop.f32.mrf.mxu1  ;;  %854 = vmax.xlane.f32.xlu1 %v853_v61 }
 0x10b   :  { %v724_v6 = vadd.f32 %v723_v3, %v402_v0  ;;  %v856_v7 = vsel %vm771_vm1, %v1892_v62, -inf  ;;  %v1905_v11 = vadd.f32 %v1749_v10, %v729_v60 }
 0x10c   :  { %857 = vmax.xlane.f32.xlu0 %v856_v7 }
 0x10d   :  { %v1902_v9 = vadd.f32 %v1749_v10, %v724_v6  ;;  %v865_v13 = vsel %vm771_vm1, %v1905_v11, -inf }
 0x10e   :  { %860 = vmax.xlane.f32.xlu1 %v859_v8 }
 0x10f   :  { %v862_v12 = vsel %vm771_vm1, %v1902_v9, -inf }
 0x110   :  { %863 = vmax.xlane.f32.xlu0 %v862_v12 }
 0x112   :  { %866 = vmax.xlane.f32.xlu1 %v865_v13 }
 0x15b   :  { %v777_v19 = vpop.xlane.xlu0 %776 }
 0x15c   :  { %v869_v21 = vsub.f32 %v1752_v15, %v777_v19 }
 0x15e   :  { %v902_v22 = vmul.f32 1.442695, %v869_v21 }
 0x15f   :  { %v783_v23 = vpop.xlane.xlu1 %782  ;;  %v774_v25 = vpop.xlane.xlu0 %773 }
 0x160   :  { %1409 = vpow2.f32 %v902_v22  ;;  %v871_v26 = vsub.f32 %v1760_v24, %v783_v23  ;;  %v868_v10 = vsub.f32 %v1757_v20, %v774_v25 }
 0x162   :  { %v906_v27 = vmul.f32 1.442695, %v871_v26  ;;  %v900_v31 = vmul.f32 1.442695, %v868_v10 }
 0x163   :  { %v780_v34 = vpop.xlane.xlu1 %779 }
 0x164   :  { %1411 = vpow2.f32 %v906_v27  ;;  %v870_v35 = vsub.f32 %v1767_v30, %v780_v34 }
 0x165   :  { %1413 = vpow2.f32 %v900_v31  ;;  %v786_v36 = vpop.xlane.xlu0 %785 }
 0x166   :  { %v904_v37 = vmul.f32 1.442695, %v870_v35  ;;  %v872_v40 = vsub.f32 %v1772_v38, %v786_v36 }
 0x167   :  { %v789_v15 = vpop.xlane.xlu1 %788 }
 0x168   :  { %1415 = vpow2.f32 %v904_v37  ;;  %v908_v43 = vmul.f32 1.442695, %v872_v40  ;;  %v873_v44 = vsub.f32 %v1775_v39, %v789_v15 }
 0x169   :  { %v792_v45 = vpop.xlane.xlu0 %791 }
 0x16a   :  { %v910_v24 = vmul.f32 1.442695, %v873_v44  ;;  %v874_v20 = vsub.f32 %v1782_v48, %v792_v45  ;;  %1417 = vpow2.f32 %v908_v43 }
 0x16b   :  { %v795_v50 = vpop.xlane.xlu1 %794 }
 0x16c   :  { %1419 = vpow2.f32 %v910_v24  ;;  %v912_v51 = vmul.f32 1.442695, %v874_v20  ;;  %v875_v30 = vsub.f32 %v1785_v49, %v795_v50 }
 0x16d   :  { %v1919_v52 = vpop.eup %1409  ;;  %v798_v55 = vpop.xlane.xlu0 %797 }
 0x16e   :  { %v914_v56 = vmul.f32 1.442695, %v875_v30  ;;  %v876_v38 = vsub.f32 %v1792_v58, %v798_v55  ;;  %v967_v57 = vsel %vm771_vm1, %v1919_v52, 0.0  ;;  %1421 = vpow2.f32 %v912_v51 }
 0x16f   :  { %968 = vadd.xlane.f32.xlu1 %v967_v57  ;;  %v801_v39 = vpop.xlane.xlu1 %800 }
 0x170   :  { %1423 = vpow2.f32 %v914_v56  ;;  %v916_v48 = vmul.f32 1.442695, %v876_v38  ;;  %v877_v60 = vsub.f32 %v1795_v59, %v801_v39 }
 0x171   :  { %v1925_v61 = vpop.eup %1411  ;;  %v804_v0 = vpop.xlane.xlu0 %803 }
 0x172   :  { %v1927_v49 = vpop.eup %1413  ;;  %v918_v3 = vmul.f32 1.442695, %v877_v60  ;;  %v878_v6 = vsub.f32 %v1802_v4, %v804_v0  ;;  %v973_v58 = vsel %vm771_vm1, %v1925_v61, 0.0  ;;  %1425 = vpow2.f32 %v916_v48 }
 0x173   :  { %974 = vadd.xlane.f32.xlu1 %v973_v58  ;;  %v807_v7 = vpop.xlane.xlu1 %806  ;;  %v964_v8 = vsel %vm771_vm1, %v1927_v49, 0.0 }
 0x174   :  { %1427 = vpow2.f32 %v918_v3  ;;  %v920_v12 = vmul.f32 1.442695, %v878_v6  ;;  %v879_v59 = vsub.f32 %v1805_v5, %v807_v7  ;;  %965 = vadd.xlane.f32.xlu0 %v964_v8 }
 0x175   :  { %v1935_v13 = vpop.eup %1415  ;;  %v810_v19 = vpop.xlane.xlu0 %809 }
 0x176   :  { %v922_v21 = vmul.f32 1.442695, %v879_v59  ;;  %v880_v4 = vsub.f32 %v1812_v16, %v810_v19  ;;  %v970_v22 = vsel %vm771_vm1, %v1935_v13, 0.0  ;;  %1429 = vpow2.f32 %v920_v12 }
 0x177   :  { %v813_v23 = vpop.xlane.xlu1 %812  ;;  %v1940_v25 = vpop.eup %1417 }
 0x178   :  { %1431 = vpow2.f32 %v922_v21  ;;  %v924_v26 = vmul.f32 1.442695, %v880_v4  ;;  %v881_v10 = vsub.f32 %v1815_v17, %v813_v23  ;;  %971 = vadd.xlane.f32.xlu0 %v970_v22  ;;  %v976_v36 = vsel %vm771_vm1, %v1940_v25, 0.0 }
 0x179   :  { %v1943_v5 = vpop.eup %1419  ;;  %v816_v27 = vpop.xlane.xlu0 %815 }
 0x17a   :  { %v926_v31 = vmul.f32 1.442695, %v881_v10  ;;  %v882_v34 = vsub.f32 %v1822_v28, %v816_v27  ;;  %v979_v16 = vsel %vm771_vm1, %v1943_v5, 0.0  ;;  %1433 = vpow2.f32 %v924_v26 }
 0x17b   :  { %980 = vadd.xlane.f32.xlu1 %v979_v16  ;;  %v819_v35 = vpop.xlane.xlu1 %818  ;;  %v1950_v37 = vpop.eup %1421 }
 0x17c   :  { %1435 = vpow2.f32 %v926_v31  ;;  %v928_v17 = vmul.f32 1.442695, %v882_v34  ;;  %v883_v40 = vsub.f32 %v1825_v29, %v819_v35  ;;  %977 = vadd.xlane.f32.xlu0 %v976_v36  ;;  %v982_v20 = vsel %vm771_vm1, %v1950_v37, 0.0 }
 0x17d   :  { %v1953_v15 = vpop.eup %1423  ;;  %v822_v43 = vpop.xlane.xlu0 %821 }
 0x17e   :  { %v930_v28 = vmul.f32 1.442695, %v883_v40  ;;  %v884_v44 = vsub.f32 %v1832_v41, %v822_v43  ;;  %v985_v45 = vsel %vm771_vm1, %v1953_v15, 0.0  ;;  %1437 = vpow2.f32 %v928_v17 }
 0x17f   :  { %986 = vadd.xlane.f32.xlu1 %v985_v45  ;;  %v825_v24 = vpop.xlane.xlu1 %824  ;;  %v1960_v50 = vpop.eup %1425 }
 0x180   :  { %1439 = vpow2.f32 %v930_v28  ;;  %v932_v29 = vmul.f32 1.442695, %v884_v44  ;;  %v885_v51 = vsub.f32 %v1835_v42, %v825_v24  ;;  %983 = vadd.xlane.f32.xlu0 %v982_v20  ;;  %v988_v39 = vsel %vm771_vm1, %v1960_v50, 0.0 }
 0x181   :  { %v1963_v30 = vpop.eup %1427  ;;  %v828_v55 = vpop.xlane.xlu0 %827 }
 0x182   :  { %v934_v41 = vmul.f32 1.442695, %v885_v51  ;;  %v886_v56 = vsub.f32 %v1842_v53, %v828_v55  ;;  %v991_v38 = vsel %vm771_vm1, %v1963_v30, 0.0  ;;  %1441 = vpow2.f32 %v932_v29 }
 0x183   :  { %992 = vadd.xlane.f32.xlu1 %v991_v38  ;;  %v831_v57 = vpop.xlane.xlu1 %830  ;;  %v1970_v48 = vpop.eup %1429 }
 0x184   :  { %1443 = vpow2.f32 %v934_v41  ;;  %v936_v42 = vmul.f32 1.442695, %v886_v56  ;;  %v887_v60 = vsub.f32 %v1845_v54, %v831_v57  ;;  %989 = vadd.xlane.f32.xlu0 %v988_v39  ;;  %v994_v8 = vsel %vm771_vm1, %v1970_v48, 0.0 }
 0x185   :  { %v1973_v0 = vpop.eup %1431  ;;  %v834_v3 = vpop.xlane.xlu0 %833 }
 0x186   :  { %v938_v53 = vmul.f32 1.442695, %v887_v60  ;;  %v888_v6 = vsub.f32 %v1852_v1, %v834_v3  ;;  %v997_v58 = vsel %vm771_vm1, %v1973_v0, 0.0  ;;  %1445 = vpow2.f32 %v936_v42 }
 0x187   :  { %998 = vadd.xlane.f32.xlu1 %v997_v58  ;;  %v837_v7 = vpop.xlane.xlu1 %836  ;;  %v1980_v12 = vpop.eup %1433 }
 0x188   :  { %1447 = vpow2.f32 %v938_v53  ;;  %v940_v54 = vmul.f32 1.442695, %v888_v6  ;;  %v889_v59 = vsub.f32 %v1855_v2, %v837_v7  ;;  %995 = vadd.xlane.f32.xlu0 %v994_v8  ;;  %v1000_v26 = vsel %vm771_vm1, %v1980_v12, 0.0 }
 0x189   :  { %v1983_v19 = vpop.eup %1435  ;;  %v840_v21 = vpop.xlane.xlu0 %839 }
 0x18a   :  { %v942_v1 = vmul.f32 1.442695, %v889_v59  ;;  %v890_v4 = vsub.f32 %v1862_v14, %v840_v21  ;;  %v1003_v22 = vsel %vm771_vm1, %v1983_v19, 0.0  ;;  %1449 = vpow2.f32 %v940_v54 }
 0x18b   :  { %1004 = vadd.xlane.f32.xlu1 %v1003_v22  ;;  %v843_v23 = vpop.xlane.xlu1 %842  ;;  %v1990_v10 = vpop.eup %1437 }
 0x18c   :  { %1451 = vpow2.f32 %v942_v1  ;;  %v944_v2 = vmul.f32 1.442695, %v890_v4  ;;  %v891_v27 = vsub.f32 %v1865_v18, %v843_v23  ;;  %1001 = vadd.xlane.f32.xlu0 %v1000_v26  ;;  %v1006_v17 = vsel %vm771_vm1, %v1990_v10, 0.0 }
 0x18d   :  { %v1993_v31 = vpop.eup %1439  ;;  %v846_v34 = vpop.xlane.xlu0 %845 }
 0x18e   :  { %v946_v14 = vmul.f32 1.442695, %v891_v27  ;;  %v892_v16 = vsub.f32 %v1872_v32, %v846_v34  ;;  %v1009_v35 = vsel %vm771_vm1, %v1993_v31, 0.0  ;;  %1453 = vpow2.f32 %v944_v2 }
 0x18f   :  { %1010 = vadd.xlane.f32.xlu1 %v1009_v35  ;;  %v849_v36 = vpop.xlane.xlu1 %848  ;;  %v2000_v40 = vpop.eup %1441 }
 0x190   :  { %1455 = vpow2.f32 %v946_v14  ;;  %v948_v18 = vmul.f32 1.442695, %v892_v16  ;;  %v893_v43 = vsub.f32 %v1875_v33, %v849_v36  ;;  %1007 = vadd.xlane.f32.xlu0 %v1006_v17  ;;  %v1012_v29 = vsel %vm771_vm1, %v2000_v40, 0.0 }
 0x191   :  { %v2003_v28 = vpop.eup %1443  ;;  %v852_v44 = vpop.xlane.xlu0 %851 }
 0x192   :  { %v950_v32 = vmul.f32 1.442695, %v893_v43  ;;  %v894_v45 = vsub.f32 %v1882_v46, %v852_v44  ;;  %v1015_v24 = vsel %vm771_vm1, %v2003_v28, 0.0  ;;  %1457 = vpow2.f32 %v948_v18 }
 0x193   :  { %1016 = vadd.xlane.f32.xlu1 %v1015_v24  ;;  %v855_v20 = vpop.xlane.xlu1 %854  ;;  %v2010_v51 = vpop.eup %1445 }
 0x194   :  { %1459 = vpow2.f32 %v950_v32  ;;  %v952_v33 = vmul.f32 1.442695, %v894_v45  ;;  %v895_v55 = vsub.f32 %v1885_v47, %v855_v20  ;;  %1013 = vadd.xlane.f32.xlu0 %v1012_v29  ;;  %v1018_v42 = vsel %vm771_vm1, %v2010_v51, 0.0 }
 0x195   :  { %v2013_v41 = vpop.eup %1447  ;;  %v858_v56 = vpop.xlane.xlu0 %857 }
 0x196   :  { %v954_v46 = vmul.f32 1.442695, %v895_v55  ;;  %v896_v38 = vsub.f32 %v1892_v62, %v858_v56  ;;  %v1021_v57 = vsel %vm771_vm1, %v2013_v41, 0.0  ;;  %1461 = vpow2.f32 %v952_v33 }
 0x197   :  { %1022 = vadd.xlane.f32.xlu1 %v1021_v57  ;;  %v861_v39 = vpop.xlane.xlu1 %860  ;;  %v2020_v60 = vpop.eup %1449 }
 0x198   :  { %1463 = vpow2.f32 %v954_v46  ;;  %v956_v47 = vmul.f32 1.442695, %v896_v38  ;;  %v897_v3 = vsub.f32 %v1895_v63, %v861_v39  ;;  %1019 = vadd.xlane.f32.xlu0 %v1018_v42  ;;  %v1024_v54 = vsel %vm771_vm1, %v2020_v60, 0.0 }
 0x199   :  { %v2023_v53 = vpop.eup %1451  ;;  %v864_v6 = vpop.xlane.xlu0 %863 }
 0x19a   :  { %v958_v62 = vmul.f32 1.442695, %v897_v3  ;;  %v898_v58 = vsub.f32 %v1902_v9, %v864_v6  ;;  %v1027_v7 = vsel %vm771_vm1, %v2023_v53, 0.0  ;;  %1465 = vpow2.f32 %v956_v47 }
 0x19b   :  { %1028 = vadd.xlane.f32.xlu1 %v1027_v7  ;;  %v867_v8 = vpop.xlane.xlu1 %866  ;;  %v2030_v59 = vpop.eup %1453 }
 0x19c   :  { %1467 = vpow2.f32 %v958_v62  ;;  %v960_v63 = vmul.f32 1.442695, %v898_v58  ;;  %v899_v21 = vsub.f32 %v1905_v11, %v867_v8  ;;  %1025 = vadd.xlane.f32.xlu0 %v1024_v54  ;;  %v1030_v22 = vsel %vm771_vm1, %v2030_v59, 0.0 }
 0x19d   :  { %v2033_v1 = vpop.eup %1455 }
 0x19e   :  { %v962_v4 = vmul.f32 1.442695, %v899_v21  ;;  %v1033_v9 = vsel %vm771_vm1, %v2033_v1, 0.0  ;;  %1469 = vpow2.f32 %v960_v63 }
 0x19f   :  { %1034 = vadd.xlane.f32.xlu1 %v1033_v9  ;;  %v2039_v23 = vpop.eup %1457 }
 0x1a0   :  { %1471 = vpow2.f32 %v962_v4  ;;  %1031 = vadd.xlane.f32.xlu0 %v1030_v22  ;;  %v1036_v2 = vsel %vm771_vm1, %v2039_v23, 0.0 }
 0x1a1   :  { %v2041_v26 = vpop.eup %1459 }
 0x1a2   :  { %v1039_v11 = vsel %vm771_vm1, %v2041_v26, 0.0 }
 0x1a3   :  { %1040 = vadd.xlane.f32.xlu1 %v1039_v11  ;;  %v2047_v27 = vpop.eup %1461 }
 0x1a4   :  { %1037 = vadd.xlane.f32.xlu0 %v1036_v2  ;;  %v1042_v16 = vsel %vm771_vm1, %v2047_v27, 0.0 }
 0x1a5   :  { %v2049_v34 = vpop.eup %1463 }
 0x1a6   :  { %v1045_v14 = vsel %vm771_vm1, %v2049_v34, 0.0 }
 0x1a7   :  { %1046 = vadd.xlane.f32.xlu1 %v1045_v14  ;;  %v2055_v35 = vpop.eup %1465 }
 0x1a8   :  { %1043 = vadd.xlane.f32.xlu0 %v1042_v16  ;;  %v1048_v18 = vsel %vm771_vm1, %v2055_v35, 0.0 }
 0x1a9   :  { %v2057_v36 = vpop.eup %1467 }
 0x1aa   :  { %v1051_v17 = vsel %vm771_vm1, %v2057_v36, 0.0 }
 0x1ab   :  { %1052 = vadd.xlane.f32.xlu1 %v1051_v17  ;;  %v2063_v43 = vpop.eup %1469 }
 0x1ac   :  { %1049 = vadd.xlane.f32.xlu0 %v1048_v18  ;;  %v1054_v45 = vsel %vm771_vm1, %v2063_v43, 0.0 }
 0x1ad   :  { %v2065_v44 = vpop.eup %1471 }
 0x1ae   :  { %v1057_v32 = vsel %vm771_vm1, %v2065_v44, 0.0 }
 0x1af   :  { %1058 = vadd.xlane.f32.xlu1 %v1057_v32 }
 0x1b0   :  { %1055 = vadd.xlane.f32.xlu0 %v1054_v45 }
 0x1f8   :  { %v969_v24 = vpop.xlane.xlu1 %968 }
 0x1f9   :  { %1473 = vrcp.f32 %v969_v24 }
 0x1fc   :  { %v975_v20 = vpop.xlane.xlu1 %974 }
 0x1fd   :  { %1475 = vrcp.f32 %v975_v20  ;;  %v966_v29 = vpop.xlane.xlu0 %965 }
 0x1fe   :  { %1477 = vrcp.f32 %v966_v29 }
 0x201   :  { %v972_v33 = vpop.xlane.xlu0 %971 }
 0x202   :  { %1479 = vrcp.f32 %v972_v33 }
 0x204   :  { %v981_v55 = vpop.xlane.xlu1 %980 }
 0x205   :  { %1481 = vrcp.f32 %v981_v55  ;;  %v978_v56 = vpop.xlane.xlu0 %977 }
 0x206   :  { %v1474_v46 = vpop.eup %1473  ;;  %1483 = vrcp.f32 %v978_v56 }
 0x207   :  { %v1063_v38 = vmul.f32 %v1474_v46, %v1919_v52 }
 0x208   :  { %v987_v57 = vpop.xlane.xlu1 %986 }
 0x209   :  { %1125 = vst.msk [vmem:[%s2235_s4 + $0x8] sm:$0xff] %vm771_vm1, %v1063_v38  ;;  %1485 = vrcp.f32 %v987_v57  ;;  %v984_v39 = vpop.xlane.xlu0 %983 }
 0x20a   :  { %v1476_v42 = vpop.eup %1475  ;;  %1487 = vrcp.f32 %v984_v39 }
 0x20b   :  { %v1478_v47 = vpop.eup %1477  ;;  %v1067_v3 = vmul.f32 %v1476_v42, %v1925_v61 }
 0x20c   :  { %v1061_v6 = vmul.f32 %v1478_v47, %v1927_v49  ;;  %v993_v62 = vpop.xlane.xlu1 %992 }
 0x20d   :  { %1127 = vst.msk [vmem:[%s2235_s4 + $0x18] sm:$0xff] %vm771_vm1, %v1067_v3  ;;  %1489 = vrcp.f32 %v993_v62  ;;  %v990_v52 = vpop.xlane.xlu0 %989 }
 0x20e   :  { %1124 = vst.msk [vmem:[%s2235_s4] sm:$0xff] %vm771_vm1, %v1061_v6  ;;  %1491 = vrcp.f32 %v990_v52 }
 0x20f   :  { %v1480_v58 = vpop.eup %1479 }
 0x210   :  { %v1065_v7 = vmul.f32 %v1480_v58, %v1935_v13  ;;  %v999_v61 = vpop.xlane.xlu1 %998 }
 0x211   :  { %1493 = vrcp.f32 %v999_v61  ;;  %v996_v49 = vpop.xlane.xlu0 %995 }
 0x212   :  { %v1482_v8 = vpop.eup %1481  ;;  %1126 = vst.msk [vmem:[%s2235_s4 + $0x10] sm:$0xff] %vm771_vm1, %v1065_v7  ;;  %1495 = vrcp.f32 %v996_v49 }
 0x213   :  { %v1484_v54 = vpop.eup %1483  ;;  %v1071_v63 = vmul.f32 %v1482_v8, %v1943_v5 }
 0x214   :  { %v1069_v21 = vmul.f32 %v1484_v54, %v1940_v25  ;;  %v1005_v4 = vpop.xlane.xlu1 %1004 }
 0x215   :  { %1129 = vst.msk [vmem:[%s2235_s4 + $0x28] sm:$0xff] %vm771_vm1, %v1071_v63  ;;  %1497 = vrcp.f32 %v1005_v4  ;;  %v1002_v13 = vpop.xlane.xlu0 %1001 }
 0x216   :  { %v1486_v9 = vpop.eup %1485  ;;  %1128 = vst.msk [vmem:[%s2235_s4 + $0x20] sm:$0xff] %vm771_vm1, %v1069_v21  ;;  %1499 = vrcp.f32 %v1002_v13 }
 0x217   :  { %v1488_v22 = vpop.eup %1487  ;;  %v1075_v5 = vmul.f32 %v1486_v9, %v1953_v15 }
 0x218   :  { %v1073_v25 = vmul.f32 %v1488_v22, %v1950_v37  ;;  %v1011_v11 = vpop.xlane.xlu1 %1010 }
 0x219   :  { %1131 = vst.msk [vmem:[%s2235_s4 + $0x38] sm:$0xff] %vm771_vm1, %v1075_v5  ;;  %1501 = vrcp.f32 %v1011_v11  ;;  %v1008_v2 = vpop.xlane.xlu0 %1007 }
 0x21a   :  { %v1490_v14 = vpop.eup %1489  ;;  %1130 = vst.msk [vmem:[%s2235_s4 + $0x30] sm:$0xff] %vm771_vm1, %v1073_v25  ;;  %1503 = vrcp.f32 %v1008_v2 }
 0x21b   :  { %v1492_v16 = vpop.eup %1491  ;;  %v1079_v15 = vmul.f32 %v1490_v14, %v1963_v30 }
 0x21c   :  { %v1077_v37 = vmul.f32 %v1492_v16, %v1960_v50  ;;  %v1017_v17 = vpop.xlane.xlu1 %1016 }
 0x21d   :  { %1133 = vst.msk [vmem:[%s2235_s4 + $0x48] sm:$0xff] %vm771_vm1, %v1079_v15  ;;  %1505 = vrcp.f32 %v1017_v17  ;;  %v1014_v18 = vpop.xlane.xlu0 %1013 }
 0x21e   :  { %v1494_v32 = vpop.eup %1493  ;;  %1132 = vst.msk [vmem:[%s2235_s4 + $0x40] sm:$0xff] %vm771_vm1, %v1077_v37  ;;  %1507 = vrcp.f32 %v1014_v18 }
 0x21f   :  { %v1496_v45 = vpop.eup %1495  ;;  %v1083_v30 = vmul.f32 %v1494_v32, %v1973_v0 }
 0x220   :  { %v1081_v50 = vmul.f32 %v1496_v45, %v1970_v48  ;;  %v1023_v24 = vpop.xlane.xlu1 %1022 }
 0x221   :  { %1135 = vst.msk [vmem:[%s2235_s4 + $0x58] sm:$0xff] %vm771_vm1, %v1083_v30  ;;  %1509 = vrcp.f32 %v1023_v24  ;;  %v1020_v20 = vpop.xlane.xlu0 %1019 }
 0x222   :  { %v1498_v29 = vpop.eup %1497  ;;  %1134 = vst.msk [vmem:[%s2235_s4 + $0x50] sm:$0xff] %vm771_vm1, %v1081_v50  ;;  %1511 = vrcp.f32 %v1020_v20 }
 0x223   :  { %v1500_v33 = vpop.eup %1499  ;;  %v1087_v0 = vmul.f32 %v1498_v29, %v1983_v19 }
 0x224   :  { %v1085_v48 = vmul.f32 %v1500_v33, %v1980_v12  ;;  %v1029_v55 = vpop.xlane.xlu1 %1028 }
 0x225   :  { %1137 = vst.msk [vmem:[%s2235_s4 + $0x68] sm:$0xff] %vm771_vm1, %v1087_v0  ;;  %1513 = vrcp.f32 %v1029_v55  ;;  %v1026_v56 = vpop.xlane.xlu0 %1025 }
 0x226   :  { %v1502_v46 = vpop.eup %1501  ;;  %1136 = vst.msk [vmem:[%s2235_s4 + $0x60] sm:$0xff] %vm771_vm1, %v1085_v48  ;;  %1515 = vrcp.f32 %v1026_v56 }
 0x227   :  { %v1504_v38 = vpop.eup %1503  ;;  %v1091_v19 = vmul.f32 %v1502_v46, %v1993_v31 }
 0x228   :  { %v1089_v12 = vmul.f32 %v1504_v38, %v1990_v10  ;;  %v1035_v57 = vpop.xlane.xlu1 %1034 }
 0x229   :  { %1139 = vst.msk [vmem:[%s2235_s4 + $0x78] sm:$0xff] %vm771_vm1, %v1091_v19  ;;  %1517 = vrcp.f32 %v1035_v57  ;;  %v1032_v39 = vpop.xlane.xlu0 %1031 }
 0x22a   :  { %v1506_v42 = vpop.eup %1505  ;;  %1138 = vst.msk [vmem:[%s2235_s4 + $0x70] sm:$0xff] %vm771_vm1, %v1089_v12  ;;  %1519 = vrcp.f32 %v1032_v39 }
 0x22b   :  { %v1508_v47 = vpop.eup %1507  ;;  %v1095_v31 = vmul.f32 %v1506_v42, %v2003_v28 }
 0x22c   :  { %v1093_v10 = vmul.f32 %v1508_v47, %v2000_v40  ;;  %v1041_v3 = vpop.xlane.xlu1 %1040 }
 0x22d   :  { %1141 = vst.msk [vmem:[%s2235_s4 + $0x88] sm:$0xff] %vm771_vm1, %v1095_v31  ;;  %1521 = vrcp.f32 %v1041_v3  ;;  %v1038_v6 = vpop.xlane.xlu0 %1037 }
 0x22e   :  { %v1510_v62 = vpop.eup %1509  ;;  %1140 = vst.msk [vmem:[%s2235_s4 + $0x80] sm:$0xff] %vm771_vm1, %v1093_v10  ;;  %1523 = vrcp.f32 %v1038_v6 }
 0x22f   :  { %v1512_v52 = vpop.eup %1511  ;;  %v1099_v28 = vmul.f32 %v1510_v62, %v2013_v41 }
 0x230   :  { %v1097_v40 = vmul.f32 %v1512_v52, %v2010_v51  ;;  %v1047_v58 = vpop.xlane.xlu1 %1046 }
 0x231   :  { %1143 = vst.msk [vmem:[%s2235_s4 + $0x98] sm:$0xff] %vm771_vm1, %v1099_v28  ;;  %1525 = vrcp.f32 %v1047_v58  ;;  %v1044_v7 = vpop.xlane.xlu0 %1043 }
 0x232   :  { %v1514_v61 = vpop.eup %1513  ;;  %1142 = vst.msk [vmem:[%s2235_s4 + $0x90] sm:$0xff] %vm771_vm1, %v1097_v40  ;;  %1527 = vrcp.f32 %v1044_v7 }
 0x233   :  { %v1516_v49 = vpop.eup %1515  ;;  %v1103_v41 = vmul.f32 %v1514_v61, %v2023_v53 }
 0x234   :  { %v1101_v51 = vmul.f32 %v1516_v49, %v2020_v60  ;;  %v1053_v8 = vpop.xlane.xlu1 %1052 }
 0x235   :  { %1145 = vst.msk [vmem:[%s2235_s4 + $0xa8] sm:$0xff] %vm771_vm1, %v1103_v41  ;;  %1529 = vrcp.f32 %v1053_v8  ;;  %v1050_v54 = vpop.xlane.xlu0 %1049 }
 0x236   :  { %v1518_v63 = vpop.eup %1517  ;;  %1144 = vst.msk [vmem:[%s2235_s4 + $0xa0] sm:$0xff] %vm771_vm1, %v1101_v51  ;;  %1531 = vrcp.f32 %v1050_v54 }
 0x237   :  { %v1520_v21 = vpop.eup %1519  ;;  %v1107_v53 = vmul.f32 %v1518_v63, %v2033_v1 }
 0x238   :  { %v1105_v60 = vmul.f32 %v1520_v21, %v2030_v59  ;;  %v1059_v4 = vpop.xlane.xlu1 %1058 }
 0x239   :  { %1147 = vst.msk [vmem:[%s2235_s4 + $0xb8] sm:$0xff] %vm771_vm1, %v1107_v53  ;;  %1533 = vrcp.f32 %v1059_v4  ;;  %v1056_v13 = vpop.xlane.xlu0 %1055 }
 0x23a   :  { %v1522_v9 = vpop.eup %1521  ;;  %1146 = vst.msk [vmem:[%s2235_s4 + $0xb0] sm:$0xff] %vm771_vm1, %v1105_v60  ;;  %1535 = vrcp.f32 %v1056_v13 }
 0x23b   :  { %v1524_v22 = vpop.eup %1523  ;;  %v1111_v1 = vmul.f32 %v1522_v9, %v2041_v26 }
 0x23c   :  { %v1109_v59 = vmul.f32 %v1524_v22, %v2039_v23 }
 0x23d   :  { %1149 = vst.msk [vmem:[%s2235_s4 + $0xc8] sm:$0xff] %vm771_vm1, %v1111_v1 }
 0x23e   :  { %v1526_v5 = vpop.eup %1525  ;;  %1148 = vst.msk [vmem:[%s2235_s4 + $0xc0] sm:$0xff] %vm771_vm1, %v1109_v59 }
 0x23f   :  { %v1528_v25 = vpop.eup %1527  ;;  %v1115_v11 = vmul.f32 %v1526_v5, %v2049_v34 }
 0x240   :  { %v1113_v2 = vmul.f32 %v1528_v25, %v2047_v27 }
 0x241   :  { %1151 = vst.msk [vmem:[%s2235_s4 + $0xd8] sm:$0xff] %vm771_vm1, %v1115_v11 }
 0x242   :  { %v1530_v23 = vpop.eup %1529  ;;  %1150 = vst.msk [vmem:[%s2235_s4 + $0xd0] sm:$0xff] %vm771_vm1, %v1113_v2 }
 0x243   :  { %v1532_v26 = vpop.eup %1531  ;;  %v1119_v14 = vmul.f32 %v1530_v23, %v2057_v36 }
 0x244   :  { %v1117_v16 = vmul.f32 %v1532_v26, %v2055_v35 }
 0x245   :  { %1153 = vst.msk [vmem:[%s2235_s4 + $0xe8] sm:$0xff] %vm771_vm1, %v1119_v14 }
 0x246   :  { %v1534_v27 = vpop.eup %1533  ;;  %1152 = vst.msk [vmem:[%s2235_s4 + $0xe0] sm:$0xff] %vm771_vm1, %v1117_v16 }
 0x247   :  { %v1536_v34 = vpop.eup %1535  ;;  %v1123_v15 = vmul.f32 %v1534_v27, %v2065_v44 }
 0x248   :  { %v1121_v37 = vmul.f32 %v1536_v34, %v2063_v43 }
 0x249   :  { %1155 = vst.msk [vmem:[%s2235_s4 + $0xf8] sm:$0xff] %vm771_vm1, %v1123_v15 }
 0x24a   :  { %1154 = vst.msk [vmem:[%s2235_s4 + $0xf0] sm:$0xff] %vm771_vm1, %v1121_v37 }

</bundles_post_ra>
